<compile_context>
chip_gen: v7x
topology: tpu7x:2x2x1
jax: 0.10.0
libtpu: 0.0.40
codegen_flags: <defaults>
</compile_context>

<pallas_src>
import jax
import jax.numpy as jnp
from jax.experimental import pallas as pl
from jax.experimental.pallas import tpu as pltpu


def _round_up(a: int, m: int) -> int:
    return ((a + m - 1) // m) * m


def enthead_kernel(x_ref, w1_ref, b1_ref, w2_ref, b2_ref, w3_ref, b3_ref,
                   w4_ref, b4_ref, o_ref):
    """Fused 4-layer MLP: (Linear+ReLU) x3 + final Linear on one batch tile.

    Layers 1-2: bf16 MXU inputs, f32 accumulation (dominant FLOPs / bytes).
    Layers 3-4: tiny feature dims -> full f32 for logits precision.
    Bias-add / ReLU always in f32 on the VPU.
    """
    x = x_ref[...].astype(jnp.bfloat16)

    h = jnp.dot(x, w1_ref[...], preferred_element_type=jnp.float32) + b1_ref[...]
    h = jnp.maximum(h, 0.0)

    h = jnp.dot(h.astype(jnp.bfloat16), w2_ref[...],
                preferred_element_type=jnp.float32) + b2_ref[...]
    h = jnp.maximum(h, 0.0)

    h = jnp.dot(h, w3_ref[...], preferred_element_type=jnp.float32) + b3_ref[...]
    h = jnp.maximum(h, 0.0)

    y = jnp.dot(h, w4_ref[...], preferred_element_type=jnp.float32) + b4_ref[...]
    o_ref[...] = y.astype(o_ref.dtype)


def prepare_params(params):
    """One-time weight packing (call outside the hot path / cache the result).

    Output feature dims are zero-padded to multiples of 128 (lane-dense
    matmuls and unmasked stores); the layer-1 contraction dim stays at the
    true in_dim because x is streamed unpadded.  Zero padding is numerically
    exact (padded weight rows/cols and bias entries are zero, ReLU(0)=0).
    w1/w2 are stored bf16, w3/w4 stay f32 (tiny), biases f32.
    """
    ws = [params[f"w{i}"] for i in range(1, 5)]
    bs = [params[f"b{i}"] for i in range(1, 5)]
    in_dim = ws[0].shape[0]
    n_class = ws[3].shape[1]

    pouts = [_round_up(w.shape[1], 128) for w in ws]
    dins = [in_dim] + pouts[:-1]                  # layer-i input = prev padded out
    wdtypes = [jnp.bfloat16, jnp.bfloat16, jnp.float32, jnp.float32]

    wps, bps = [], []
    for w, b, din_p, dout_p, dt in zip(ws, bs, dins, pouts, wdtypes):
        wp = jnp.zeros((din_p, dout_p), dt)
        wp = wp.at[: w.shape[0], : w.shape[1]].set(w.astype(dt))
        bp = jnp.zeros((1, dout_p), jnp.float32)
        bp = bp.at[:, : b.shape[1]].set(b.astype(jnp.float32))
        wps.append(wp)
        bps.append(bp)

    return {"wps": tuple(wps), "bps": tuple(bps), "in_dim": in_dim,
            "n_class": n_class, "out_pad": pouts[-1]}


def enthead_forward(x, prepared, *, batch_tile=512, min_batch_blocks=1):
    """x: (B, in_dim) float32.  prepared: output of prepare_params().

    batch_tile: per-grid-step rows (512 default; ~1024 on v6e if VMEM allows,
    256-512 on v5e/v7x).  min_batch_blocks: set 2 on v7x so both TensorCores
    receive grid steps via dimension_semantics=("parallel",).
    """
    B, in_dim = x.shape
    assert in_dim == prepared["in_dim"], (in_dim, prepared["in_dim"])
    wps, bps = prepared["wps"], prepared["bps"]
    out_pad = prepared["out_pad"]
    n_class = prepared["n_class"]

    # ---- batch tile: sublane-aligned, never larger than needed, optionally
    # capped so the grid has >= min_batch_blocks steps.
    bt = max(8, min(int(batch_tile), _round_up(B, 8)))
    bt = _round_up(bt, 8)
    if min_batch_blocks > 1:
        bt = min(bt, max(8, _round_up(pl.cdiv(B, min_batch_blocks), 8)))
    grid = (pl.cdiv(B, bt),)

    # ---- explicit VMEM budget from the real footprint
    def _nbytes(a):
        return a.size * a.dtype.itemsize

    x_tile_bytes = bt * in_dim * x.dtype.itemsize
    out_tile_bytes = bt * out_pad * 4
    weight_bytes = sum(_nbytes(w) for w in wps) + sum(_nbytes(b) for b in bps)
    act_bytes = bt * sum(w.shape[1] for w in wps) * 4

    def _run(single_buffer_weights):
        def _const_spec(shape):
            if single_buffer_weights:
                return pl.BlockSpec(shape, lambda i: (0, 0),
                                    pipeline_mode=pl.Buffered(1))
            return pl.BlockSpec(shape, lambda i: (0, 0))

        in_specs = [pl.BlockSpec((bt, in_dim), lambda i: (i, 0))]  # x batch tile
        for wp, bp in zip(wps, bps):
            in_specs.append(_const_spec(wp.shape))
            in_specs.append(_const_spec(bp.shape))

        w_factor = 1 if single_buffer_weights else 2
        vmem_est = (2 * x_tile_bytes + 2 * out_tile_bytes
                    + w_factor * weight_bytes + act_bytes)
        vmem_limit = int(min(128 << 20,
                             max(16 << 20, (vmem_est * 3) // 2 + (2 << 20))))

        return pl.pallas_call(
            enthead_kernel,
            out_shape=jax.ShapeDtypeStruct((B, out_pad), jnp.float32),
            grid=grid,
            in_specs=in_specs,
            out_specs=pl.BlockSpec((bt, out_pad), lambda i: (i, 0)),
            compiler_params=pltpu.CompilerParams(
                dimension_semantics=("parallel",),
                vmem_limit_bytes=vmem_limit),
        )(x, wps[0], bps[0], wps[1], bps[1], wps[2], bps[2], wps[3], bps[3])

    try:
        out_padded = _run(single_buffer_weights=True)
    except Exception:
        # TODO(synk): drop fallback once pl.Buffered(1) single-buffering of
        # grid-invariant specs is guaranteed on the deployed jax version.
        out_padded = _run(single_buffer_weights=False)

    return out_padded[:, :n_class]


def init_params(key, in_dim, lat_dim, n_class):
    """Synthetic init mirroring nn.Linear default U(-1/sqrt(fan_in), 1/sqrt(fan_in)).

    Weights stored pre-transposed as (in_features, out_features) so the kernel
    computes y = x @ W + b  (== x @ W_pt.T + b in PyTorch).
    """
    dims = [
        (in_dim, in_dim // 4),
        (in_dim // 4, in_dim // 8),
        (in_dim // 8, lat_dim),
        (lat_dim, n_class),
    ]
    params = {}
    for idx, (din, dout) in enumerate(dims, start=1):
        key, kw, kb = jax.random.split(key, 3)
        bound = 1.0 / jnp.sqrt(jnp.float32(din))
        params[f"w{idx}"] = jax.random.uniform(
            kw, (din, dout), jnp.float32, minval=-bound, maxval=bound)
        params[f"b{idx}"] = jax.random.uniform(
            kb, (1, dout), jnp.float32, minval=-bound, maxval=bound)
    return params


def enthead_ref(x, params):
    """Pure-JAX f32 reference of the same forward pass."""
    h = x
    for i in (1, 2, 3):
        h = jnp.maximum(h @ params[f"w{i}"] + params[f"b{i}"], 0.0)
    return h @ params["w4"] + params["b4"]


if __name__ == "__main__":
    key = jax.random.PRNGKey(0)
    B, in_dim, lat_dim, n_class = 16, 32, 20, 10  # dims: 32 -> 8 -> 4 -> 20 -> 10

    key, kx = jax.random.split(key)
    x = jax.random.normal(kx, (B, in_dim), jnp.float32)
    params = init_params(key, in_dim, lat_dim, n_class)

    prepared = prepare_params(params)        # one-time weight packing
    out = enthead_forward(x, prepared, batch_tile=512)
    out = jax.block_until_ready(out)

    ref = enthead_ref(x, params)
    assert out.shape == (B, n_class), out.shape
    # bf16 on layers 1-2 (f32 accumulate), full f32 on layers 3-4
    assert jnp.allclose(out, ref, atol=2e-2, rtol=2e-2), "mismatch vs reference"

    print("KERNEL_OK")
</pallas_src>

<mosaic_0001>
module attributes {stable_mosaic.version = 11 : i64} {
  func.func @enthead_kernel(%arg0: i32, %arg1: memref<16x32xf32, #tpu.memory_space<vmem>>, %arg2: memref<32x128xbf16, #tpu.memory_space<vmem>>, %arg3: memref<1x128xf32, #tpu.memory_space<vmem>>, %arg4: memref<128x128xbf16, #tpu.memory_space<vmem>>, %arg5: memref<1x128xf32, #tpu.memory_space<vmem>>, %arg6: memref<128x128xf32, #tpu.memory_space<vmem>>, %arg7: memref<1x128xf32, #tpu.memory_space<vmem>>, %arg8: memref<128x128xf32, #tpu.memory_space<vmem>>, %arg9: memref<1x128xf32, #tpu.memory_space<vmem>>, %arg10: memref<16x128xf32, #tpu.memory_space<vmem>>) attributes {dimension_semantics = [#tpu.dimension_semantics<parallel>], iteration_bounds = array<i64: 1>, scalar_prefetch = 0 : i64, scratch_operands = 0 : i64, tpu.core_type = #tpu.core_type<tc>, window_params = [{transform_indices = @transform_0, window_bounds = array<i64: 16, 32>}, {pipeline_mode = #tpu.pipeline_mode<synchronous>, transform_indices = @transform_1, window_bounds = array<i64: 32, 128>}, {pipeline_mode = #tpu.pipeline_mode<synchronous>, transform_indices = @transform_2, window_bounds = array<i64: 1, 128>}, {pipeline_mode = #tpu.pipeline_mode<synchronous>, transform_indices = @transform_3, window_bounds = array<i64: 128, 128>}, {pipeline_mode = #tpu.pipeline_mode<synchronous>, transform_indices = @transform_4, window_bounds = array<i64: 1, 128>}, {pipeline_mode = #tpu.pipeline_mode<synchronous>, transform_indices = @transform_5, window_bounds = array<i64: 128, 128>}, {pipeline_mode = #tpu.pipeline_mode<synchronous>, transform_indices = @transform_6, window_bounds = array<i64: 1, 128>}, {pipeline_mode = #tpu.pipeline_mode<synchronous>, transform_indices = @transform_7, window_bounds = array<i64: 128, 128>}, {pipeline_mode = #tpu.pipeline_mode<synchronous>, transform_indices = @transform_8, window_bounds = array<i64: 1, 128>}, {transform_indices = @transform_9, window_bounds = array<i64: 16, 128>}]} {
    %c0 = arith.constant 0 : index
    %c0_0 = arith.constant 0 : index
    %0 = vector.load %arg1[%c0, %c0_0] : memref<16x32xf32, #tpu.memory_space<vmem>>, vector<16x32xf32>
    %1 = arith.truncf %0 : vector<16x32xf32> to vector<16x32xbf16>
    %c0_1 = arith.constant 0 : index
    %c0_2 = arith.constant 0 : index
    %2 = vector.load %arg2[%c0_1, %c0_2] : memref<32x128xbf16, #tpu.memory_space<vmem>>, vector<32x128xbf16>
    %cst = arith.constant dense<0.000000e+00> : vector<16x128xf32>
    %3 = tpu.matmul %1, %2, %cst {dimension_numbers = #tpu.dot_dimension_numbers<[1], [0], [0], [1], [0, 0, 1, 1], [], []>} : vector<16x32xbf16>, vector<32x128xbf16>, vector<16x128xf32> -> vector<16x128xf32>
    %c0_3 = arith.constant 0 : index
    %c0_4 = arith.constant 0 : index
    %4 = vector.load %arg3[%c0_3, %c0_4] : memref<1x128xf32, #tpu.memory_space<vmem>>, vector<1x128xf32>
    %5 = vector.broadcast %4 : vector<1x128xf32> to vector<16x128xf32>
    %6 = arith.addf %3, %5 : vector<16x128xf32>
    %cst_5 = arith.constant 0.000000e+00 : f32
    %7 = vector.broadcast %cst_5 : f32 to vector<16x128xf32>
    %8 = arith.maximumf %6, %7 : vector<16x128xf32>
    %9 = arith.truncf %8 : vector<16x128xf32> to vector<16x128xbf16>
    %c0_6 = arith.constant 0 : index
    %c0_7 = arith.constant 0 : index
    %10 = vector.load %arg4[%c0_6, %c0_7] : memref<128x128xbf16, #tpu.memory_space<vmem>>, vector<128x128xbf16>
    %cst_8 = arith.constant dense<0.000000e+00> : vector<16x128xf32>
    %11 = tpu.matmul %9, %10, %cst_8 {dimension_numbers = #tpu.dot_dimension_numbers<[1], [0], [0], [1], [0, 0, 1, 1], [], []>} : vector<16x128xbf16>, vector<128x128xbf16>, vector<16x128xf32> -> vector<16x128xf32>
    %c0_9 = arith.constant 0 : index
    %c0_10 = arith.constant 0 : index
    %12 = vector.load %arg5[%c0_9, %c0_10] : memref<1x128xf32, #tpu.memory_space<vmem>>, vector<1x128xf32>
    %13 = vector.broadcast %12 : vector<1x128xf32> to vector<16x128xf32>
    %14 = arith.addf %11, %13 : vector<16x128xf32>
    %cst_11 = arith.constant 0.000000e+00 : f32
    %15 = vector.broadcast %cst_11 : f32 to vector<16x128xf32>
    %16 = arith.maximumf %14, %15 : vector<16x128xf32>
    %c0_12 = arith.constant 0 : index
    %c0_13 = arith.constant 0 : index
    %17 = vector.load %arg6[%c0_12, %c0_13] : memref<128x128xf32, #tpu.memory_space<vmem>>, vector<128x128xf32>
    %cst_14 = arith.constant dense<0.000000e+00> : vector<16x128xf32>
    %18 = tpu.matmul %16, %17, %cst_14 {dimension_numbers = #tpu.dot_dimension_numbers<[1], [0], [0], [1], [0, 0, 1, 1], [], []>} : vector<16x128xf32>, vector<128x128xf32>, vector<16x128xf32> -> vector<16x128xf32>
    %c0_15 = arith.constant 0 : index
    %c0_16 = arith.constant 0 : index
    %19 = vector.load %arg7[%c0_15, %c0_16] : memref<1x128xf32, #tpu.memory_space<vmem>>, vector<1x128xf32>
    %20 = vector.broadcast %19 : vector<1x128xf32> to vector<16x128xf32>
    %21 = arith.addf %18, %20 : vector<16x128xf32>
    %cst_17 = arith.constant 0.000000e+00 : f32
    %22 = vector.broadcast %cst_17 : f32 to vector<16x128xf32>
    %23 = arith.maximumf %21, %22 : vector<16x128xf32>
    %c0_18 = arith.constant 0 : index
    %c0_19 = arith.constant 0 : index
    %24 = vector.load %arg8[%c0_18, %c0_19] : memref<128x128xf32, #tpu.memory_space<vmem>>, vector<128x128xf32>
    %cst_20 = arith.constant dense<0.000000e+00> : vector<16x128xf32>
    %25 = tpu.matmul %23, %24, %cst_20 {dimension_numbers = #tpu.dot_dimension_numbers<[1], [0], [0], [1], [0, 0, 1, 1], [], []>} : vector<16x128xf32>, vector<128x128xf32>, vector<16x128xf32> -> vector<16x128xf32>
    %c0_21 = arith.constant 0 : index
    %c0_22 = arith.constant 0 : index
    %26 = vector.load %arg9[%c0_21, %c0_22] : memref<1x128xf32, #tpu.memory_space<vmem>>, vector<1x128xf32>
    %27 = vector.broadcast %26 : vector<1x128xf32> to vector<16x128xf32>
    %28 = arith.addf %25, %27 : vector<16x128xf32>
    %c0_23 = arith.constant 0 : index
    %c0_24 = arith.constant 0 : index
    %29 = vector.load %arg10[%c0_23, %c0_24] : memref<16x128xf32, #tpu.memory_space<vmem>>, vector<16x128xf32>
    tpu.vector_store %arg10[%c0_23, %c0_24], %28 {strides = array<i32>} : memref<16x128xf32, #tpu.memory_space<vmem>>, vector<16x128xf32>,
    return
  }
  func.func @transform_0(%arg0: i32) -> (i32, i32) {
    %c0_i32 = arith.constant 0 : i32
    %c0_i32_0 = arith.constant 0 : i32
    return %arg0, %c0_i32 : i32, i32
  }
  func.func @transform_1(%arg0: i32) -> (i32, i32) {
    %c0_i32 = arith.constant 0 : i32
    %c0_i32_0 = arith.constant 0 : i32
    %c0_i32_1 = arith.constant 0 : i32
    return %c0_i32, %c0_i32_0 : i32, i32
  }
  func.func @transform_2(%arg0: i32) -> (i32, i32) {
    %c0_i32 = arith.constant 0 : i32
    %c0_i32_0 = arith.constant 0 : i32
    %c0_i32_1 = arith.constant 0 : i32
    return %c0_i32, %c0_i32_0 : i32, i32
  }
  func.func @transform_3(%arg0: i32) -> (i32, i32) {
    %c0_i32 = arith.constant 0 : i32
    %c0_i32_0 = arith.constant 0 : i32
    %c0_i32_1 = arith.constant 0 : i32
    return %c0_i32, %c0_i32_0 : i32, i32
  }
  func.func @transform_4(%arg0: i32) -> (i32, i32) {
    %c0_i32 = arith.constant 0 : i32
    %c0_i32_0 = arith.constant 0 : i32
    %c0_i32_1 = arith.constant 0 : i32
    return %c0_i32, %c0_i32_0 : i32, i32
  }
  func.func @transform_5(%arg0: i32) -> (i32, i32) {
    %c0_i32 = arith.constant 0 : i32
    %c0_i32_0 = arith.constant 0 : i32
    %c0_i32_1 = arith.constant 0 : i32
    return %c0_i32, %c0_i32_0 : i32, i32
  }
  func.func @transform_6(%arg0: i32) -> (i32, i32) {
    %c0_i32 = arith.constant 0 : i32
    %c0_i32_0 = arith.constant 0 : i32
    %c0_i32_1 = arith.constant 0 : i32
    return %c0_i32, %c0_i32_0 : i32, i32
  }
  func.func @transform_7(%arg0: i32) -> (i32, i32) {
    %c0_i32 = arith.constant 0 : i32
    %c0_i32_0 = arith.constant 0 : i32
    %c0_i32_1 = arith.constant 0 : i32
    return %c0_i32, %c0_i32_0 : i32, i32
  }
  func.func @transform_8(%arg0: i32) -> (i32, i32) {
    %c0_i32 = arith.constant 0 : i32
    %c0_i32_0 = arith.constant 0 : i32
    %c0_i32_1 = arith.constant 0 : i32
    return %c0_i32, %c0_i32_0 : i32, i32
  }
  func.func @transform_9(%arg0: i32) -> (i32, i32) {
    %c0_i32 = arith.constant 0 : i32
    %c0_i32_0 = arith.constant 0 : i32
    return %arg0, %c0_i32 : i32, i32
  }
}

module attributes {stable_mosaic.version = 11 : i64} {
  func.func @enthead_kernel(%arg0: i32, %arg1: memref<16x32xf32, #tpu.memory_space<vmem>>, %arg2: memref<32x128xbf16, #tpu.memory_space<vmem>>, %arg3: memref<1x128xf32, #tpu.memory_space<vmem>>, %arg4: memref<128x128xbf16, #tpu.memory_space<vmem>>, %arg5: memref<1x128xf32, #tpu.memory_space<vmem>>, %arg6: memref<128x128xf32, #tpu.memory_space<vmem>>, %arg7: memref<1x128xf32, #tpu.memory_space<vmem>>, %arg8: memref<128x128xf32, #tpu.memory_space<vmem>>, %arg9: memref<1x128xf32, #tpu.memory_space<vmem>>, %arg10: memref<16x128xf32, #tpu.memory_space<vmem>>) attributes {dimension_semantics = [#tpu.dimension_semantics<parallel>], iteration_bounds = array<i64: 1>, scalar_prefetch = 0 : i64, scratch_operands = 0 : i64, tpu.core_type = #tpu.core_type<tc>, window_params = [{transform_indices = @transform_0, window_bounds = array<i64: 16, 32>}, {pipeline_mode = #tpu.pipeline_mode<synchronous>, transform_indices = @transform_1, window_bounds = array<i64: 32, 128>}, {pipeline_mode = #tpu.pipeline_mode<synchronous>, transform_indices = @transform_2, window_bounds = array<i64: 1, 128>}, {pipeline_mode = #tpu.pipeline_mode<synchronous>, transform_indices = @transform_3, window_bounds = array<i64: 128, 128>}, {pipeline_mode = #tpu.pipeline_mode<synchronous>, transform_indices = @transform_4, window_bounds = array<i64: 1, 128>}, {pipeline_mode = #tpu.pipeline_mode<synchronous>, transform_indices = @transform_5, window_bounds = array<i64: 128, 128>}, {pipeline_mode = #tpu.pipeline_mode<synchronous>, transform_indices = @transform_6, window_bounds = array<i64: 1, 128>}, {pipeline_mode = #tpu.pipeline_mode<synchronous>, transform_indices = @transform_7, window_bounds = array<i64: 128, 128>}, {pipeline_mode = #tpu.pipeline_mode<synchronous>, transform_indices = @transform_8, window_bounds = array<i64: 1, 128>}, {transform_indices = @transform_9, window_bounds = array<i64: 16, 128>}]} {
    %c0 = arith.constant 0 : index
    %c0_0 = arith.constant 0 : index
    %0 = vector.load %arg1[%c0, %c0_0] : memref<16x32xf32, #tpu.memory_space<vmem>>, vector<16x32xf32>
    %1 = arith.truncf %0 : vector<16x32xf32> to vector<16x32xbf16>
    %c0_1 = arith.constant 0 : index
    %c0_2 = arith.constant 0 : index
    %2 = vector.load %arg2[%c0_1, %c0_2] : memref<32x128xbf16, #tpu.memory_space<vmem>>, vector<32x128xbf16>
    %cst = arith.constant dense<0.000000e+00> : vector<16x128xf32>
    %3 = tpu.matmul %1, %2, %cst {dimension_numbers = #tpu.dot_dimension_numbers<[1], [0], [0], [1], [0, 0, 1, 1], [], []>} : vector<16x32xbf16>, vector<32x128xbf16>, vector<16x128xf32> -> vector<16x128xf32>
    %c0_3 = arith.constant 0 : index
    %c0_4 = arith.constant 0 : index
    %4 = vector.load %arg3[%c0_3, %c0_4] : memref<1x128xf32, #tpu.memory_space<vmem>>, vector<1x128xf32>
    %5 = vector.broadcast %4 : vector<1x128xf32> to vector<16x128xf32>
    %6 = arith.addf %3, %5 : vector<16x128xf32>
    %cst_5 = arith.constant 0.000000e+00 : f32
    %7 = vector.broadcast %cst_5 : f32 to vector<16x128xf32>
    %8 = arith.maximumf %6, %7 : vector<16x128xf32>
    %9 = arith.truncf %8 : vector<16x128xf32> to vector<16x128xbf16>
    %c0_6 = arith.constant 0 : index
    %c0_7 = arith.constant 0 : index
    %10 = vector.load %arg4[%c0_6, %c0_7] : memref<128x128xbf16, #tpu.memory_space<vmem>>, vector<128x128xbf16>
    %cst_8 = arith.constant dense<0.000000e+00> : vector<16x128xf32>
    %11 = tpu.matmul %9, %10, %cst_8 {dimension_numbers = #tpu.dot_dimension_numbers<[1], [0], [0], [1], [0, 0, 1, 1], [], []>} : vector<16x128xbf16>, vector<128x128xbf16>, vector<16x128xf32> -> vector<16x128xf32>
    %c0_9 = arith.constant 0 : index
    %c0_10 = arith.constant 0 : index
    %12 = vector.load %arg5[%c0_9, %c0_10] : memref<1x128xf32, #tpu.memory_space<vmem>>, vector<1x128xf32>
    %13 = vector.broadcast %12 : vector<1x128xf32> to vector<16x128xf32>
    %14 = arith.addf %11, %13 : vector<16x128xf32>
    %cst_11 = arith.constant 0.000000e+00 : f32
    %15 = vector.broadcast %cst_11 : f32 to vector<16x128xf32>
    %16 = arith.maximumf %14, %15 : vector<16x128xf32>
    %c0_12 = arith.constant 0 : index
    %c0_13 = arith.constant 0 : index
    %17 = vector.load %arg6[%c0_12, %c0_13] : memref<128x128xf32, #tpu.memory_space<vmem>>, vector<128x128xf32>
    %cst_14 = arith.constant dense<0.000000e+00> : vector<16x128xf32>
    %18 = tpu.matmul %16, %17, %cst_14 {dimension_numbers = #tpu.dot_dimension_numbers<[1], [0], [0], [1], [0, 0, 1, 1], [], []>} : vector<16x128xf32>, vector<128x128xf32>, vector<16x128xf32> -> vector<16x128xf32>
    %c0_15 = arith.constant 0 : index
    %c0_16 = arith.constant 0 : index
    %19 = vector.load %arg7[%c0_15, %c0_16] : memref<1x128xf32, #tpu.memory_space<vmem>>, vector<1x128xf32>
    %20 = vector.broadcast %19 : vector<1x128xf32> to vector<16x128xf32>
    %21 = arith.addf %18, %20 : vector<16x128xf32>
    %cst_17 = arith.constant 0.000000e+00 : f32
    %22 = vector.broadcast %cst_17 : f32 to vector<16x128xf32>
    %23 = arith.maximumf %21, %22 : vector<16x128xf32>
    %c0_18 = arith.constant 0 : index
    %c0_19 = arith.constant 0 : index
    %24 = vector.load %arg8[%c0_18, %c0_19] : memref<128x128xf32, #tpu.memory_space<vmem>>, vector<128x128xf32>
    %cst_20 = arith.constant dense<0.000000e+00> : vector<16x128xf32>
    %25 = tpu.matmul %23, %24, %cst_20 {dimension_numbers = #tpu.dot_dimension_numbers<[1], [0], [0], [1], [0, 0, 1, 1], [], []>} : vector<16x128xf32>, vector<128x128xf32>, vector<16x128xf32> -> vector<16x128xf32>
    %c0_21 = arith.constant 0 : index
    %c0_22 = arith.constant 0 : index
    %26 = vector.load %arg9[%c0_21, %c0_22] : memref<1x128xf32, #tpu.memory_space<vmem>>, vector<1x128xf32>
    %27 = vector.broadcast %26 : vector<1x128xf32> to vector<16x128xf32>
    %28 = arith.addf %25, %27 : vector<16x128xf32>
    %c0_23 = arith.constant 0 : index
    %c0_24 = arith.constant 0 : index
    %29 = vector.load %arg10[%c0_23, %c0_24] : memref<16x128xf32, #tpu.memory_space<vmem>>, vector<16x128xf32>
    tpu.vector_store %arg10[%c0_23, %c0_24], %28 {strides = array<i32>} : memref<16x128xf32, #tpu.memory_space<vmem>>, vector<16x128xf32>,
    return
  }
  func.func @transform_0(%arg0: i32) -> (i32, i32) {
    %c0_i32 = arith.constant 0 : i32
    %c0_i32_0 = arith.constant 0 : i32
    return %arg0, %c0_i32 : i32, i32
  }
  func.func @transform_1(%arg0: i32) -> (i32, i32) {
    %c0_i32 = arith.constant 0 : i32
    %c0_i32_0 = arith.constant 0 : i32
    %c0_i32_1 = arith.constant 0 : i32
    return %c0_i32, %c0_i32_0 : i32, i32
  }
  func.func @transform_2(%arg0: i32) -> (i32, i32) {
    %c0_i32 = arith.constant 0 : i32
    %c0_i32_0 = arith.constant 0 : i32
    %c0_i32_1 = arith.constant 0 : i32
    return %c0_i32, %c0_i32_0 : i32, i32
  }
  func.func @transform_3(%arg0: i32) -> (i32, i32) {
    %c0_i32 = arith.constant 0 : i32
    %c0_i32_0 = arith.constant 0 : i32
    %c0_i32_1 = arith.constant 0 : i32
    return %c0_i32, %c0_i32_0 : i32, i32
  }
  func.func @transform_4(%arg0: i32) -> (i32, i32) {
    %c0_i32 = arith.constant 0 : i32
    %c0_i32_0 = arith.constant 0 : i32
    %c0_i32_1 = arith.constant 0 : i32
    return %c0_i32, %c0_i32_0 : i32, i32
  }
  func.func @transform_5(%arg0: i32) -> (i32, i32) {
    %c0_i32 = arith.constant 0 : i32
    %c0_i32_0 = arith.constant 0 : i32
    %c0_i32_1 = arith.constant 0 : i32
    return %c0_i32, %c0_i32_0 : i32, i32
  }
  func.func @transform_6(%arg0: i32) -> (i32, i32) {
    %c0_i32 = arith.constant 0 : i32
    %c0_i32_0 = arith.constant 0 : i32
    %c0_i32_1 = arith.constant 0 : i32
    return %c0_i32, %c0_i32_0 : i32, i32
  }
  func.func @transform_7(%arg0: i32) -> (i32, i32) {
    %c0_i32 = arith.constant 0 : i32
    %c0_i32_0 = arith.constant 0 : i32
    %c0_i32_1 = arith.constant 0 : i32
    return %c0_i32, %c0_i32_0 : i32, i32
  }
  func.func @transform_8(%arg0: i32) -> (i32, i32) {
    %c0_i32 = arith.constant 0 : i32
    %c0_i32_0 = arith.constant 0 : i32
    %c0_i32_1 = arith.constant 0 : i32
    return %c0_i32, %c0_i32_0 : i32, i32
  }
  func.func @transform_9(%arg0: i32) -> (i32, i32) {
    %c0_i32 = arith.constant 0 : i32
    %c0_i32_0 = arith.constant 0 : i32
    return %arg0, %c0_i32 : i32, i32
  }
}

</mosaic_0001>

<bundles_post_ra>
// kernel: tpu_custom_call.1
= control target key start
LH: loop header
LB: loop body
LE: loop exit
PB: predicated region body
PF: predicated region fallthrough
CT: control target
= control target key end

     0   :  { %14 = vsyncpa [#allocation3], 0  ;;  %s1060_s0 = inlined_call_operand.hbm [shape: f32[16,32], index: 0, kind: input, shape index: {}]   ;;  %s1061_s1 = inlined_call_operand.hbm [shape: bf16[32,128], index: 1, kind: input, shape index: {}]   ;;  %s1062_s2 = inlined_call_operand.vmem [shape: f32[1,128], index: 2, kind: input, shape index: {}]   ;;  %s1063_s3 = inlined_call_operand.hbm [shape: bf16[128,128], index: 3, kind: input, shape index: {}]   ;;  %s1064_s4 = inlined_call_operand.vmem [shape: f32[1,128], index: 4, kind: input, shape index: {}]   ;;  %s1065_s5 = inlined_call_operand.hbm [shape: f32[128,128], index: 5, kind: input, shape index: {}]   ;;  %s1066_s6 = inlined_call_operand.vmem [shape: f32[1,128], index: 6, kind: input, shape index: {}]   ;;  %s1067_s7 = inlined_call_operand.hbm [shape: f32[128,128], index: 7, kind: input, shape index: {}]   ;;  %s1068_s8 = inlined_call_operand.vmem [shape: f32[1,128], index: 8, kind: input, shape index: {}]   ;;  %s1069_s9 = inlined_call_operand.hbm [shape: f32[16,128], index: 9, kind: output, shape index: {}]  }
   0x1   :  { %15 = vsyncpa [#allocation6], 0 }
   0x2   :  { %16 = vsyncpa [#allocation9], 0 }
   0x3   :  { %17 = vsyncpa [#allocation4], 0  ;;  %s896_s30 = smov [#allocation5]   ;;  %s756_s13 = scalar_lea.hbm %s1061_s1, 256 }
   0x4   :  { %s35_s10 = sshll.u32 %s896_s30, 4  ;;  %p757_p0 = scmp.ne.s32.totalorder %s1061_s1, %s756_s13  ;;  %s36_s10 = int_to_ptr.vmem [resolvable:$true] %s35_s10 }
   0x5   :  { %p760_p1 = scmp.lt.u32.totalorder %s756_s13, %s1061_s1 }
   0x7   :  { %p762_p2 = pnand %p760_p1, %p757_p0 }
   0x9   :  { %765 = shalt.err (!%p762_p2)
}
   0xa   :  { %s766_s18 = scalar_lea.vmem %s36_s10, 256  ;;  %p771_p4 = scmp.lt.s32.totalorder %s36_s10, %s36_s10 }
   0xb   :  { %p767_p3 = scmp.ne.s32.totalorder %s36_s10, %s766_s18  ;;  %p772_p5 = scmp.lt.s32.totalorder %s766_s18, %s766_s18 }
   0xd   :  { %p773_p6 = por %p772_p5, %p771_p4 }
   0xf   :  { %p774_p7 = pnand %p773_p6, %p767_p3 }
  0x11   :  { %777 = shalt.err (!%p774_p7)
}
  0x12   :  { %s897_s19 = smov 64   ;;  %s898_s20 = smov 4  }
  0x13   :  { %41 = dma.hbm_to_vmem [thread:$0]  %s1061_s1, 256, %s36_s10, [#allocation6], %s897_s19, %s897_s19, %s898_s20  }
  0x14   :  { %s899_s23 = smov [#allocation8]   ;;  %s900_s25 = smov [#allocation2]  }
  0x15   :  { %s63_s24 = sshll.u32 %s899_s23, 4  ;;  %s23_s26 = sshll.u32 %s900_s25, 4  ;;  %s64_s24 = int_to_ptr.vmem [resolvable:$true] %s63_s24  ;;  %s24_s26 = int_to_ptr.vmem [resolvable:$true] %s23_s26 }
  0x16   :  { %s778_s29 = scalar_lea.hbm %s1065_s5, 2048 }
  0x17   :  { %p779_p8 = scmp.ne.s32.totalorder %s1065_s5, %s778_s29  ;;  %p782_p9 = scmp.lt.u32.totalorder %s778_s29, %s1065_s5 }
  0x19   :  { %p784_p10 = pnand %p782_p9, %p779_p8 }
  0x1b   :  { %787 = shalt.err (!%p784_p10)
}
  0x1c   :  { %s788_s1 = scalar_lea.vmem %s64_s24, 2048  ;;  %p793_p12 = scmp.lt.s32.totalorder %s64_s24, %s64_s24 }
  0x1d   :  { %p789_p11 = scmp.ne.s32.totalorder %s64_s24, %s788_s1  ;;  %p794_p13 = scmp.lt.s32.totalorder %s788_s1, %s788_s1 }
  0x1f   :  { %p795_p0 = por %p794_p13, %p793_p12 }
  0x21   :  { %p796_p1 = pnand %p795_p0, %p789_p11 }
  0x23   :  { %799 = shalt.err (!%p796_p1)
}
  0x24   :  { %s901_s10 = smov 128   ;;  %s902_s14 = smov 8  }
  0x25   :  { %69 = dma.hbm_to_vmem [thread:$0]  %s1065_s5, 2048, %s64_s24, [#allocation9], %s901_s10, %s901_s10, %s902_s14  }
  0x26   :  { %s800_s21 = scalar_lea.hbm %s1060_s0, 256 }
  0x27   :  { %p801_p2 = scmp.ne.s32.totalorder %s1060_s0, %s800_s21  ;;  %p804_p3 = scmp.lt.u32.totalorder %s800_s21, %s1060_s0 }
  0x29   :  { %p806_p4 = pnand %p804_p3, %p801_p2 }
  0x2b   :  { %809 = shalt.err (!%p806_p4)
}
  0x2c   :  { %s810_s28 = scalar_lea.vmem %s24_s26, 256  ;;  %p815_p6 = scmp.lt.s32.totalorder %s24_s26, %s24_s26 }
  0x2d   :  { %p811_p5 = scmp.ne.s32.totalorder %s24_s26, %s810_s28  ;;  %p816_p7 = scmp.lt.s32.totalorder %s810_s28, %s810_s28 }
  0x2f   :  { %p817_p8 = por %p816_p7, %p815_p6 }
  0x31   :  { %p818_p9 = pnand %p817_p8, %p811_p5 }
  0x33   :  { %821 = shalt.err (!%p818_p9)
}
  0x34   :  { %29 = dma.hbm_to_vmem [thread:$0]  %s1060_s0, 256, %s24_s26, [#allocation3], %s901_s10, %s901_s10, %s902_s14  }
  0x35   :  { %s903_s29 = smov [#allocation7]   ;;  %s904_s11 = smov [#allocation10]  }
  0x36   :  { %s49_s30 = sshll.u32 %s903_s29, 4  ;;  %s77_s12 = sshll.u32 %s904_s11, 4  ;;  %s50_s30 = int_to_ptr.vmem [resolvable:$true] %s49_s30  ;;  %s78_s12 = int_to_ptr.vmem [resolvable:$true] %s77_s12 }
  0x37   :  { %s822_s15 = scalar_lea.hbm %s1063_s3, 1024 }
  0x38   :  { %p823_p10 = scmp.ne.s32.totalorder %s1063_s3, %s822_s15  ;;  %p826_p11 = scmp.lt.u32.totalorder %s822_s15, %s1063_s3 }
  0x3a   :  { %p828_p12 = pnand %p826_p11, %p823_p10 }
  0x3c   :  { %831 = shalt.err (!%p828_p12)
}
  0x3d   :  { %s832_s0 = scalar_lea.vmem %s50_s30, 1024  ;;  %p837_p0 = scmp.lt.s32.totalorder %s50_s30, %s50_s30 }
  0x3e   :  { %p833_p13 = scmp.ne.s32.totalorder %s50_s30, %s832_s0  ;;  %p838_p1 = scmp.lt.s32.totalorder %s832_s0, %s832_s0 }
  0x40   :  { %p839_p2 = por %p838_p1, %p837_p0 }
  0x42   :  { %p840_p3 = pnand %p839_p2, %p833_p13 }
  0x44   :  { %843 = shalt.err (!%p840_p3)
}
  0x45   :  { %55 = dma.hbm_to_vmem [thread:$0]  %s1063_s3, 1024, %s50_s30, [#allocation6], %s897_s19, %s897_s19, %s898_s20  }
  0x46   :  { %s844_s27 = scalar_lea.hbm %s1067_s7, 2048 }
  0x47   :  { %p845_p4 = scmp.ne.s32.totalorder %s1067_s7, %s844_s27  ;;  %p848_p5 = scmp.lt.u32.totalorder %s844_s27, %s1067_s7 }
  0x49   :  { %p850_p6 = pnand %p848_p5, %p845_p4 }
  0x4b   :  { %853 = shalt.err (!%p850_p6)
}
  0x4c   :  { %s854_s11 = scalar_lea.vmem %s78_s12, 2048  ;;  %p859_p8 = scmp.lt.s32.totalorder %s78_s12, %s78_s12 }
  0x4d   :  { %p855_p7 = scmp.ne.s32.totalorder %s78_s12, %s854_s11  ;;  %p860_p9 = scmp.lt.s32.totalorder %s854_s11, %s854_s11 }
  0x4f   :  { %p861_p10 = por %p860_p9, %p859_p8 }
  0x51   :  { %p862_p11 = pnand %p861_p10, %p855_p7 }
  0x53   :  { %865 = shalt.err (!%p862_p11)
}
  0x54   :  { %83 = dma.hbm_to_vmem [thread:$0]  %s1067_s7, 2048, %s78_s12, [#allocation9], %s901_s10, %s901_s10, %s902_s14  }
  0x55   :  { %888 = dma.done.wait [#allocation3], 256  }
  0x56   :  { %889 = vsyncadd [#allocation3], 4294967040 }
  0x57   :  { %890 = dma.done.wait [#allocation6], 1280  }
  0x58   :  { %891 = vsyncadd [#allocation6], 4294966016 }
  0x59   :  { %892 = dma.done.wait [#allocation9], 4096  }
  0x5a   :  { %893 = vsyncadd [#allocation9], 4294963200  ;;  %v905_v0 = vmov 0.0   ;;  %vm906_vm0 = vmmov 0   ;;  %v746_v1 = vld [vmem:[#allocation5] sm:$0xff]   ;;  %v747_v2 = vld [vmem:[#allocation5 + $0x8] sm:$0xff]  }
  0x5b   :  { %572 = vmatprep.subr.bf16.mxu0 %v905_v0  ;;  %576 = vmatprep.mubr.msk.bf16.mxu0 %vm906_vm0, %v905_v0  ;;  %v102_v3 = vld [vmem:[#allocation2] sm:$0xff]  ;;  %v103_v4 = vld [vmem:[#allocation2 + $0x8] sm:$0xff]  ;;  %vm128_vm1 = vcmask 261120   ;;  %v750_v8 = vld [vmem:[#allocation7 + $0x10] sm:$0xff]   ;;  %s907_s15 = smov [#allocation11]  }
  0x5c   :  { %580 = vmatprep.subr.bf16.mxu1 %v905_v0  ;;  %596 = vmatprep.mubr.msk.bf16.mxu1 %vm906_vm0, %v905_v0  ;;  %v748_v5 = vld [vmem:[#allocation7] sm:$0xff]   ;;  %v104_v6 = vpack.c.bf16 %v103_v4, %v102_v3  ;;  %v749_v7 = vld [vmem:[#allocation7 + $0x8] sm:$0xff]   ;;  %v751_v9 = vld [vmem:[#allocation7 + $0x18] sm:$0xff]   ;;  %s495_s16 = sshll.u32 %s907_s15, 4  ;;  %s496_s16 = int_to_ptr.vmem [resolvable:$true] %s495_s16 }
  0x5d   :  { %573 = vmatpush3.bf16.msra.mxu0 %v746_v1  ;;  %581 = vmatpush3.bf16.msra.mxu1 %v748_v5  ;;  %v752_v10 = vld [vmem:[#allocation7 + $0x20] sm:$0xff]   ;;  %v753_v11 = vld [vmem:[#allocation7 + $0x28] sm:$0xff]   ;;  %v754_v12 = vld [vmem:[#allocation7 + $0x30] sm:$0xff]   ;;  %p871_p13 = scmp.lt.s32.totalorder %s496_s16, %s496_s16 }
  0x5e   :  { %574 = vmatprep.subr.bf16.mxu0 %v905_v0  ;;  %582 = vmatprep.subr.bf16.mxu1 %v905_v0  ;;  %v755_v13 = vld [vmem:[#allocation7 + $0x38] sm:$0xff]   ;;  %v290_v14 = vld [vmem:[#allocation8] sm:$0xff]  ;;  %v291_v15 = vld [vmem:[#allocation8 + $0x8] sm:$0xff] }
  0x5f   :  { %v292_v16 = vld [vmem:[#allocation8 + $0x10] sm:$0xff]  ;;  %v670_v17 = vpack.c.bf16 %v291_v15, %v290_v14  ;;  %v293_v18 = vld [vmem:[#allocation8 + $0x18] sm:$0xff]  ;;  %v294_v20 = vld [vmem:[#allocation8 + $0x20] sm:$0xff] }
  0x60   :  { %v674_v19 = vpack.c.bf16 %v293_v18, %v292_v16  ;;  %v295_v21 = vld [vmem:[#allocation8 + $0x28] sm:$0xff]  ;;  %v296_v23 = vld [vmem:[#allocation8 + $0x30] sm:$0xff]  ;;  %v297_v24 = vld [vmem:[#allocation8 + $0x38] sm:$0xff] }
  0x61   :  { %575 = vmatpush3.bf16.msra.mxu0 %v747_v2  ;;  %583 = vmatpush3.bf16.msra.mxu1 %v749_v7  ;;  %v678_v22 = vpack.c.bf16 %v295_v21, %v294_v20  ;;  %v682_v25 = vpack.c.bf16 %v297_v24, %v296_v23  ;;  %v298_v26 = vld [vmem:[#allocation8 + $0x40] sm:$0xff]  ;;  %v299_v27 = vld [vmem:[#allocation8 + $0x48] sm:$0xff]  ;;  %v300_v29 = vld [vmem:[#allocation8 + $0x50] sm:$0xff] }
  0x62   :  { %584 = vmatprep.subr.bf16.mxu1 %v905_v0  ;;  %671 = vmatprep.subr.bf16.mxu0 %v670_v17  ;;  %v686_v28 = vpack.c.bf16 %v299_v27, %v298_v26  ;;  %v301_v30 = vld [vmem:[#allocation8 + $0x58] sm:$0xff]  ;;  %v302_v32 = vld [vmem:[#allocation8 + $0x60] sm:$0xff]  ;;  %v303_v33 = vld [vmem:[#allocation8 + $0x68] sm:$0xff] }
  0x63   :  { %v690_v31 = vpack.c.bf16 %v301_v30, %v300_v29  ;;  %v694_v34 = vpack.c.bf16 %v303_v33, %v302_v32  ;;  %v509_v35 = vld [vmem:[%s1062_s2] ss:$0 sm:$0xff]  ;;  %v304_v45 = vld [vmem:[#allocation8 + $0x70] sm:$0xff]  ;;  %v305_v46 = vld [vmem:[#allocation8 + $0x78] sm:$0xff] }
  0x64   :  { %577 = vmatmul.mubr.msk.bf16.vlgmr.msra.gmra.mrb[0].mxu0 %vm128_vm1, %v104_v6  ;;  %v698_v47 = vpack.c.bf16 %v305_v46, %v304_v45  ;;  %v390_v48 = vld [vmem:[#allocation10] sm:$0xff]  ;;  %v391_v49 = vld [vmem:[#allocation10 + $0x8] sm:$0xff]  ;;  %v392_v50 = vld [vmem:[#allocation10 + $0x10] sm:$0xff] }
  0x65   :  { %585 = vmatpush3.bf16.msra.mxu1 %v750_v8  ;;  %673 = vmatpush3.bf16.msra.mxu0 %v670_v17  ;;  %v702_v51 = vpack.c.bf16 %v391_v49, %v390_v48  ;;  %v393_v52 = vld [vmem:[#allocation10 + $0x18] sm:$0xff]  ;;  %v394_v54 = vld [vmem:[#allocation10 + $0x20] sm:$0xff]  ;;  %v395_v55 = vld [vmem:[#allocation10 + $0x28] sm:$0xff] }
  0x66   :  { %586 = vmatprep.subr.bf16.mxu1 %v905_v0  ;;  %675 = vmatprep.subr.bf16.mxu0 %v674_v19  ;;  %v706_v53 = vpack.c.bf16 %v393_v52, %v392_v50  ;;  %v710_v56 = vpack.c.bf16 %v395_v55, %v394_v54  ;;  %v396_v57 = vld [vmem:[#allocation10 + $0x30] sm:$0xff]  ;;  %v397_v58 = vld [vmem:[#allocation10 + $0x38] sm:$0xff]  ;;  %v398_v60 = vld [vmem:[#allocation10 + $0x40] sm:$0xff] }
  0x67   :  { %v714_v59 = vpack.c.bf16 %v397_v58, %v396_v57  ;;  %v399_v61 = vld [vmem:[#allocation10 + $0x48] sm:$0xff]  ;;  %v400_v63 = vld [vmem:[#allocation10 + $0x50] sm:$0xff]  ;;  %v402_v2 = vld [vmem:[#allocation10 + $0x60] sm:$0xff] }
  0x68   :  { %v718_v62 = vpack.c.bf16 %v399_v61, %v398_v60  ;;  %v403_v3 = vld [vmem:[#allocation10 + $0x68] sm:$0xff]  ;;  %v513_v5 = vld [vmem:[%s1064_s4] ss:$0 sm:$0xff]  ;;  %v404_v14 = vld [vmem:[#allocation10 + $0x70] sm:$0xff] }
  0x69   :  { %587 = vmatpush3.bf16.msra.mxu1 %v751_v9  ;;  %677 = vmatpush3.bf16.msra.mxu0 %v674_v19  ;;  %v726_v4 = vpack.c.bf16 %v403_v3, %v402_v2  ;;  %v405_v15 = vld [vmem:[#allocation10 + $0x78] sm:$0xff]  ;;  %v522_v17 = vld [vmem:[%s1066_s6] ss:$0 sm:$0xff]  ;;  %s866_s6 = scalar_lea.vmem %s496_s16, 256 }
  0x6a   :  { %588 = vmatprep.subr.bf16.mxu1 %v905_v0  ;;  %679 = vmatprep.subr.bf16.mxu0 %v678_v22  ;;  %v730_v16 = vpack.c.bf16 %v405_v15, %v404_v14  ;;  %v523_v24 = vld [vmem:[%s1068_s8] ss:$0 sm:$0xff]  ;;  %p867_p12 = scmp.ne.s32.totalorder %s496_s16, %s866_s6  ;;  %p872_p0 = scmp.lt.s32.totalorder %s866_s6, %s866_s6 }
  0x6c   :  { %p873_p1 = por %p872_p0, %p871_p13 }
  0x6d   :  { %589 = vmatpush3.bf16.msra.mxu1 %v752_v10  ;;  %681 = vmatpush3.bf16.msra.mxu0 %v678_v22 }
  0x6e   :  { %590 = vmatprep.subr.bf16.mxu1 %v905_v0  ;;  %683 = vmatprep.subr.bf16.mxu0 %v682_v25  ;;  %p874_p2 = pnand %p873_p1, %p867_p12 }
  0x71   :  { %591 = vmatpush3.bf16.msra.mxu1 %v753_v11  ;;  %685 = vmatpush3.bf16.msra.mxu0 %v682_v25 }
  0x72   :  { %592 = vmatprep.subr.bf16.mxu1 %v905_v0  ;;  %687 = vmatprep.subr.bf16.mxu0 %v686_v28 }
  0x75   :  { %593 = vmatpush3.bf16.msra.mxu1 %v754_v12  ;;  %689 = vmatpush3.bf16.msra.mxu0 %v686_v28 }
  0x76   :  { %594 = vmatprep.subr.bf16.mxu1 %v905_v0  ;;  %691 = vmatprep.subr.bf16.mxu0 %v690_v31  ;;  %v401_v0 = vld [vmem:[#allocation10 + $0x58] sm:$0xff] }
  0x77   :  { %v722_v1 = vpack.c.bf16 %v401_v0, %v400_v63 }
  0x79   :  { %595 = vmatpush3.bf16.msra.mxu1 %v755_v13  ;;  %693 = vmatpush3.bf16.msra.mxu0 %v690_v31 }
  0x7a   :  { %695 = vmatprep.subr.bf16.mxu0 %v694_v34  ;;  %703 = vmatprep.subr.bf16.mxu1 %v702_v51 }
  0x7d   :  { %697 = vmatpush3.bf16.msra.mxu0 %v694_v34 }
  0x7e   :  { %699 = vmatprep.subr.bf16.mxu0 %v698_v47 }
  0x81   :  { %701 = vmatpush3.bf16.msra.mxu0 %v698_v47 }
 0x137   :  { %v166_v36 = vpop.f32.mrb[0].mxu0 }
 0x138   :  { %v167_v37 = vadd.f32 %v509_v35, %v166_v36  ;;  %v578_v38 = vpop.f32.mrb[1].mxu0 }
 0x139   :  { %v169_v39 = vpop.f32.mrb[2].mxu0 }
 0x13a   :  { %v170_v40 = vadd.f32 %v509_v35, %v169_v39  ;;  %v579_v41 = vpop.f32.mrb[3].mxu0  ;;  %v173_v42 = vmax.f32 %v167_v37, 0.0 }
 0x13c   :  { %v174_v43 = vmax.f32 %v170_v40, 0.0 }
 0x13e   :  { %v175_v44 = vpack.c.bf16 %v174_v43, %v173_v42 }
 0x140   :  { %597 = vmatmul.mubr.bf16.vlgmr.msra.gmra.mrb[0].mxu1 %v175_v44 }
 0x141   :  { %705 = vmatpush3.bf16.msra.mxu1 %v702_v51 }
 0x142   :  { %707 = vmatprep.subr.bf16.mxu1 %v706_v53 }
 0x145   :  { %709 = vmatpush3.bf16.msra.mxu1 %v706_v53 }
 0x146   :  { %711 = vmatprep.subr.bf16.mxu1 %v710_v56 }
 0x149   :  { %713 = vmatpush3.bf16.msra.mxu1 %v710_v56 }
 0x14a   :  { %715 = vmatprep.subr.bf16.mxu1 %v714_v59 }
 0x14d   :  { %717 = vmatpush3.bf16.msra.mxu1 %v714_v59 }
 0x14e   :  { %719 = vmatprep.subr.bf16.mxu1 %v718_v62 }
 0x151   :  { %721 = vmatpush3.bf16.msra.mxu1 %v718_v62 }
 0x152   :  { %723 = vmatprep.subr.bf16.mxu1 %v722_v1 }
 0x155   :  { %725 = vmatpush3.bf16.msra.mxu1 %v722_v1 }
 0x156   :  { %727 = vmatprep.subr.bf16.mxu1 %v726_v4 }
 0x159   :  { %729 = vmatpush3.bf16.msra.mxu1 %v726_v4 }
 0x15a   :  { %731 = vmatprep.subr.bf16.mxu1 %v730_v16 }
 0x15d   :  { %733 = vmatpush3.bf16.msra.mxu1 %v730_v16 }
 0x213   :  { %v281_v6 = vpop.f32.mrb[0].mxu1 }
 0x214   :  { %v282_v7 = vadd.f32 %v513_v5, %v281_v6  ;;  %v598_v8 = vpop.f32.mrb[1].mxu1 }
 0x215   :  { %v284_v9 = vpop.f32.mrb[2].mxu1 }
 0x216   :  { %v288_v10 = vmax.f32 %v282_v7, 0.0  ;;  %v285_v11 = vadd.f32 %v513_v5, %v284_v9  ;;  %v599_v12 = vpop.f32.mrb[3].mxu1 }
 0x218   :  { %v289_v13 = vmax.f32 %v285_v11, 0.0  ;;  %632 = vmatprep.mubr.f32.mxu0 %v288_v10 }
 0x21a   :  { %633 = vmatmul.mubr.f32.vlgmr.msra.gmra.mrb[4].mxu0 %v289_v13 }
 0x2ed   :  { %v634_v18 = vpop.f32.mrb[4].mxu0 }
 0x2ee   :  { %v385_v19 = vadd.f32 %v634_v18, %v522_v17  ;;  %v379_v20 = vpop.f32.mrb[5].mxu0 }
 0x2ef   :  { %v380_v21 = vadd.f32 %v522_v17, %v379_v20 }
 0x2f0   :  { %v389_v23 = vmax.f32 %v385_v19, 0.0 }
 0x2f1   :  { %v388_v22 = vmax.f32 %v380_v21, 0.0 }
 0x2f3   :  { %667 = vmatprep.mubr.f32.mxu1 %v388_v22 }
 0x2f4   :  { %668 = vmatmul.mubr.f32.vlgmr.msra.gmra.mrb[4].mxu1 %v389_v23 }
 0x3c7   :  { %v669_v25 = vpop.f32.mrb[4].mxu1 }
 0x3c8   :  { %v485_v26 = vadd.f32 %v669_v25, %v523_v24  ;;  %v479_v27 = vpop.f32.mrb[5].mxu1 }
 0x3c9   :  { %v480_v28 = vadd.f32 %v523_v24, %v479_v27 }
 0x3ca   :  { %489 = vst [vmem:[#allocation11 + $0x8] sm:$0xff] %v485_v26 }
 0x3cb   :  { %488 = vst [vmem:[#allocation11] sm:$0xff] %v480_v28 }
 0x3cc   :  { %877 = shalt.err (!%p874_p2)
}
 0x3cd   :  { %s878_s8 = scalar_lea.hbm %s1069_s9, 256 }
 0x3ce   :  { %p879_p3 = scmp.ne.s32.totalorder %s1069_s9, %s878_s8  ;;  %p882_p4 = scmp.lt.u32.totalorder %s878_s8, %s1069_s9 }
 0x3d0   :  { %p884_p5 = pnand %p882_p4, %p879_p3 }
 0x3d2   :  { %887 = shalt.err (!%p884_p5)
}
 0x3d3   :  { %501 = dma.vmem_to_hbm [thread:$0]  %s496_s16, 256, %s1069_s9, [#allocation4], %s901_s10, %s901_s10, %s902_s14  }
 0x3d4   :  { %894 = dma.done.wait [#allocation4], 256  }
 0x3d5   :  { %895 = vsyncadd [#allocation4], 4294967040 }
 0x3d6   :  { %505 = vsyncpa [#allocation3], 1 }
 0x3d7   :  { %506 = vsyncpa [#allocation6], 1 }
 0x3d8   :  { %507 = vsyncpa [#allocation9], 1 }
 0x3d9   :  { %508 = vsyncpa [#allocation4], 1 }

// kernel: tpu_custom_call.1
= control target key start
LH: loop header
LB: loop body
LE: loop exit
PB: predicated region body
PF: predicated region fallthrough
CT: control target
= control target key end

     0   :  { %14 = vsyncpa [#allocation3], 0  ;;  %s1060_s0 = inlined_call_operand.hbm [shape: f32[16,32], index: 0, kind: input, shape index: {}]   ;;  %s1061_s1 = inlined_call_operand.hbm [shape: bf16[32,128], index: 1, kind: input, shape index: {}]   ;;  %s1062_s2 = inlined_call_operand.vmem [shape: f32[1,128], index: 2, kind: input, shape index: {}]   ;;  %s1063_s3 = inlined_call_operand.hbm [shape: bf16[128,128], index: 3, kind: input, shape index: {}]   ;;  %s1064_s4 = inlined_call_operand.vmem [shape: f32[1,128], index: 4, kind: input, shape index: {}]   ;;  %s1065_s5 = inlined_call_operand.hbm [shape: f32[128,128], index: 5, kind: input, shape index: {}]   ;;  %s1066_s6 = inlined_call_operand.vmem [shape: f32[1,128], index: 6, kind: input, shape index: {}]   ;;  %s1067_s7 = inlined_call_operand.hbm [shape: f32[128,128], index: 7, kind: input, shape index: {}]   ;;  %s1068_s8 = inlined_call_operand.vmem [shape: f32[1,128], index: 8, kind: input, shape index: {}]   ;;  %s1069_s9 = inlined_call_operand.hbm [shape: f32[16,128], index: 9, kind: output, shape index: {}]  }
   0x1   :  { %15 = vsyncpa [#allocation6], 0 }
   0x2   :  { %16 = vsyncpa [#allocation9], 0 }
   0x3   :  { %17 = vsyncpa [#allocation4], 0  ;;  %s896_s30 = smov [#allocation5]   ;;  %s756_s13 = scalar_lea.hbm %s1061_s1, 256 }
   0x4   :  { %s35_s10 = sshll.u32 %s896_s30, 4  ;;  %p757_p0 = scmp.ne.s32.totalorder %s1061_s1, %s756_s13  ;;  %s36_s10 = int_to_ptr.vmem [resolvable:$true] %s35_s10 }
   0x5   :  { %p760_p1 = scmp.lt.u32.totalorder %s756_s13, %s1061_s1 }
   0x7   :  { %p762_p2 = pnand %p760_p1, %p757_p0 }
   0x9   :  { %765 = shalt.err (!%p762_p2)
}
   0xa   :  { %s766_s18 = scalar_lea.vmem %s36_s10, 256  ;;  %p771_p4 = scmp.lt.s32.totalorder %s36_s10, %s36_s10 }
   0xb   :  { %p767_p3 = scmp.ne.s32.totalorder %s36_s10, %s766_s18  ;;  %p772_p5 = scmp.lt.s32.totalorder %s766_s18, %s766_s18 }
   0xd   :  { %p773_p6 = por %p772_p5, %p771_p4 }
   0xf   :  { %p774_p7 = pnand %p773_p6, %p767_p3 }
  0x11   :  { %777 = shalt.err (!%p774_p7)
}
  0x12   :  { %s897_s19 = smov 64   ;;  %s898_s20 = smov 4  }
  0x13   :  { %41 = dma.hbm_to_vmem [thread:$0]  %s1061_s1, 256, %s36_s10, [#allocation6], %s897_s19, %s897_s19, %s898_s20  }
  0x14   :  { %s899_s23 = smov [#allocation8]   ;;  %s900_s25 = smov [#allocation2]  }
  0x15   :  { %s63_s24 = sshll.u32 %s899_s23, 4  ;;  %s23_s26 = sshll.u32 %s900_s25, 4  ;;  %s64_s24 = int_to_ptr.vmem [resolvable:$true] %s63_s24  ;;  %s24_s26 = int_to_ptr.vmem [resolvable:$true] %s23_s26 }
  0x16   :  { %s778_s29 = scalar_lea.hbm %s1065_s5, 2048 }
  0x17   :  { %p779_p8 = scmp.ne.s32.totalorder %s1065_s5, %s778_s29  ;;  %p782_p9 = scmp.lt.u32.totalorder %s778_s29, %s1065_s5 }
  0x19   :  { %p784_p10 = pnand %p782_p9, %p779_p8 }
  0x1b   :  { %787 = shalt.err (!%p784_p10)
}
  0x1c   :  { %s788_s1 = scalar_lea.vmem %s64_s24, 2048  ;;  %p793_p12 = scmp.lt.s32.totalorder %s64_s24, %s64_s24 }
  0x1d   :  { %p789_p11 = scmp.ne.s32.totalorder %s64_s24, %s788_s1  ;;  %p794_p13 = scmp.lt.s32.totalorder %s788_s1, %s788_s1 }
  0x1f   :  { %p795_p0 = por %p794_p13, %p793_p12 }
  0x21   :  { %p796_p1 = pnand %p795_p0, %p789_p11 }
  0x23   :  { %799 = shalt.err (!%p796_p1)
}
  0x24   :  { %s901_s10 = smov 128   ;;  %s902_s14 = smov 8  }
  0x25   :  { %69 = dma.hbm_to_vmem [thread:$0]  %s1065_s5, 2048, %s64_s24, [#allocation9], %s901_s10, %s901_s10, %s902_s14  }
  0x26   :  { %s800_s21 = scalar_lea.hbm %s1060_s0, 256 }
  0x27   :  { %p801_p2 = scmp.ne.s32.totalorder %s1060_s0, %s800_s21  ;;  %p804_p3 = scmp.lt.u32.totalorder %s800_s21, %s1060_s0 }
  0x29   :  { %p806_p4 = pnand %p804_p3, %p801_p2 }
  0x2b   :  { %809 = shalt.err (!%p806_p4)
}
  0x2c   :  { %s810_s28 = scalar_lea.vmem %s24_s26, 256  ;;  %p815_p6 = scmp.lt.s32.totalorder %s24_s26, %s24_s26 }
  0x2d   :  { %p811_p5 = scmp.ne.s32.totalorder %s24_s26, %s810_s28  ;;  %p816_p7 = scmp.lt.s32.totalorder %s810_s28, %s810_s28 }
  0x2f   :  { %p817_p8 = por %p816_p7, %p815_p6 }
  0x31   :  { %p818_p9 = pnand %p817_p8, %p811_p5 }
  0x33   :  { %821 = shalt.err (!%p818_p9)
}
  0x34   :  { %29 = dma.hbm_to_vmem [thread:$0]  %s1060_s0, 256, %s24_s26, [#allocation3], %s901_s10, %s901_s10, %s902_s14  }
  0x35   :  { %s903_s29 = smov [#allocation7]   ;;  %s904_s11 = smov [#allocation10]  }
  0x36   :  { %s49_s30 = sshll.u32 %s903_s29, 4  ;;  %s77_s12 = sshll.u32 %s904_s11, 4  ;;  %s50_s30 = int_to_ptr.vmem [resolvable:$true] %s49_s30  ;;  %s78_s12 = int_to_ptr.vmem [resolvable:$true] %s77_s12 }
  0x37   :  { %s822_s15 = scalar_lea.hbm %s1063_s3, 1024 }
  0x38   :  { %p823_p10 = scmp.ne.s32.totalorder %s1063_s3, %s822_s15  ;;  %p826_p11 = scmp.lt.u32.totalorder %s822_s15, %s1063_s3 }
  0x3a   :  { %p828_p12 = pnand %p826_p11, %p823_p10 }
  0x3c   :  { %831 = shalt.err (!%p828_p12)
}
  0x3d   :  { %s832_s0 = scalar_lea.vmem %s50_s30, 1024  ;;  %p837_p0 = scmp.lt.s32.totalorder %s50_s30, %s50_s30 }
  0x3e   :  { %p833_p13 = scmp.ne.s32.totalorder %s50_s30, %s832_s0  ;;  %p838_p1 = scmp.lt.s32.totalorder %s832_s0, %s832_s0 }
  0x40   :  { %p839_p2 = por %p838_p1, %p837_p0 }
  0x42   :  { %p840_p3 = pnand %p839_p2, %p833_p13 }
  0x44   :  { %843 = shalt.err (!%p840_p3)
}
  0x45   :  { %55 = dma.hbm_to_vmem [thread:$0]  %s1063_s3, 1024, %s50_s30, [#allocation6], %s897_s19, %s897_s19, %s898_s20  }
  0x46   :  { %s844_s27 = scalar_lea.hbm %s1067_s7, 2048 }
  0x47   :  { %p845_p4 = scmp.ne.s32.totalorder %s1067_s7, %s844_s27  ;;  %p848_p5 = scmp.lt.u32.totalorder %s844_s27, %s1067_s7 }
  0x49   :  { %p850_p6 = pnand %p848_p5, %p845_p4 }
  0x4b   :  { %853 = shalt.err (!%p850_p6)
}
  0x4c   :  { %s854_s11 = scalar_lea.vmem %s78_s12, 2048  ;;  %p859_p8 = scmp.lt.s32.totalorder %s78_s12, %s78_s12 }
  0x4d   :  { %p855_p7 = scmp.ne.s32.totalorder %s78_s12, %s854_s11  ;;  %p860_p9 = scmp.lt.s32.totalorder %s854_s11, %s854_s11 }
  0x4f   :  { %p861_p10 = por %p860_p9, %p859_p8 }
  0x51   :  { %p862_p11 = pnand %p861_p10, %p855_p7 }
  0x53   :  { %865 = shalt.err (!%p862_p11)
}
  0x54   :  { %83 = dma.hbm_to_vmem [thread:$0]  %s1067_s7, 2048, %s78_s12, [#allocation9], %s901_s10, %s901_s10, %s902_s14  }
  0x55   :  { %888 = dma.done.wait [#allocation3], 256  }
  0x56   :  { %889 = vsyncadd [#allocation3], 4294967040 }
  0x57   :  { %890 = dma.done.wait [#allocation6], 1280  }
  0x58   :  { %891 = vsyncadd [#allocation6], 4294966016 }
  0x59   :  { %892 = dma.done.wait [#allocation9], 4096  }
  0x5a   :  { %893 = vsyncadd [#allocation9], 4294963200  ;;  %v905_v0 = vmov 0.0   ;;  %vm906_vm0 = vmmov 0   ;;  %v746_v1 = vld [vmem:[#allocation5] sm:$0xff]   ;;  %v747_v2 = vld [vmem:[#allocation5 + $0x8] sm:$0xff]  }
  0x5b   :  { %572 = vmatprep.subr.bf16.mxu0 %v905_v0  ;;  %576 = vmatprep.mubr.msk.bf16.mxu0 %vm906_vm0, %v905_v0  ;;  %v102_v3 = vld [vmem:[#allocation2] sm:$0xff]  ;;  %v103_v4 = vld [vmem:[#allocation2 + $0x8] sm:$0xff]  ;;  %vm128_vm1 = vcmask 261120   ;;  %v750_v8 = vld [vmem:[#allocation7 + $0x10] sm:$0xff]   ;;  %s907_s15 = smov [#allocation11]  }
  0x5c   :  { %580 = vmatprep.subr.bf16.mxu1 %v905_v0  ;;  %596 = vmatprep.mubr.msk.bf16.mxu1 %vm906_vm0, %v905_v0  ;;  %v748_v5 = vld [vmem:[#allocation7] sm:$0xff]   ;;  %v104_v6 = vpack.c.bf16 %v103_v4, %v102_v3  ;;  %v749_v7 = vld [vmem:[#allocation7 + $0x8] sm:$0xff]   ;;  %v751_v9 = vld [vmem:[#allocation7 + $0x18] sm:$0xff]   ;;  %s495_s16 = sshll.u32 %s907_s15, 4  ;;  %s496_s16 = int_to_ptr.vmem [resolvable:$true] %s495_s16 }
  0x5d   :  { %573 = vmatpush3.bf16.msra.mxu0 %v746_v1  ;;  %581 = vmatpush3.bf16.msra.mxu1 %v748_v5  ;;  %v752_v10 = vld [vmem:[#allocation7 + $0x20] sm:$0xff]   ;;  %v753_v11 = vld [vmem:[#allocation7 + $0x28] sm:$0xff]   ;;  %v754_v12 = vld [vmem:[#allocation7 + $0x30] sm:$0xff]   ;;  %p871_p13 = scmp.lt.s32.totalorder %s496_s16, %s496_s16 }
  0x5e   :  { %574 = vmatprep.subr.bf16.mxu0 %v905_v0  ;;  %582 = vmatprep.subr.bf16.mxu1 %v905_v0  ;;  %v755_v13 = vld [vmem:[#allocation7 + $0x38] sm:$0xff]   ;;  %v290_v14 = vld [vmem:[#allocation8] sm:$0xff]  ;;  %v291_v15 = vld [vmem:[#allocation8 + $0x8] sm:$0xff] }
  0x5f   :  { %v292_v16 = vld [vmem:[#allocation8 + $0x10] sm:$0xff]  ;;  %v670_v17 = vpack.c.bf16 %v291_v15, %v290_v14  ;;  %v293_v18 = vld [vmem:[#allocation8 + $0x18] sm:$0xff]  ;;  %v294_v20 = vld [vmem:[#allocation8 + $0x20] sm:$0xff] }
  0x60   :  { %v674_v19 = vpack.c.bf16 %v293_v18, %v292_v16  ;;  %v295_v21 = vld [vmem:[#allocation8 + $0x28] sm:$0xff]  ;;  %v296_v23 = vld [vmem:[#allocation8 + $0x30] sm:$0xff]  ;;  %v297_v24 = vld [vmem:[#allocation8 + $0x38] sm:$0xff] }
  0x61   :  { %575 = vmatpush3.bf16.msra.mxu0 %v747_v2  ;;  %583 = vmatpush3.bf16.msra.mxu1 %v749_v7  ;;  %v678_v22 = vpack.c.bf16 %v295_v21, %v294_v20  ;;  %v682_v25 = vpack.c.bf16 %v297_v24, %v296_v23  ;;  %v298_v26 = vld [vmem:[#allocation8 + $0x40] sm:$0xff]  ;;  %v299_v27 = vld [vmem:[#allocation8 + $0x48] sm:$0xff]  ;;  %v300_v29 = vld [vmem:[#allocation8 + $0x50] sm:$0xff] }
  0x62   :  { %584 = vmatprep.subr.bf16.mxu1 %v905_v0  ;;  %671 = vmatprep.subr.bf16.mxu0 %v670_v17  ;;  %v686_v28 = vpack.c.bf16 %v299_v27, %v298_v26  ;;  %v301_v30 = vld [vmem:[#allocation8 + $0x58] sm:$0xff]  ;;  %v302_v32 = vld [vmem:[#allocation8 + $0x60] sm:$0xff]  ;;  %v303_v33 = vld [vmem:[#allocation8 + $0x68] sm:$0xff] }
  0x63   :  { %v690_v31 = vpack.c.bf16 %v301_v30, %v300_v29  ;;  %v694_v34 = vpack.c.bf16 %v303_v33, %v302_v32  ;;  %v509_v35 = vld [vmem:[%s1062_s2] ss:$0 sm:$0xff]  ;;  %v304_v45 = vld [vmem:[#allocation8 + $0x70] sm:$0xff]  ;;  %v305_v46 = vld [vmem:[#allocation8 + $0x78] sm:$0xff] }
  0x64   :  { %577 = vmatmul.mubr.msk.bf16.vlgmr.msra.gmra.mrb[0].mxu0 %vm128_vm1, %v104_v6  ;;  %v698_v47 = vpack.c.bf16 %v305_v46, %v304_v45  ;;  %v390_v48 = vld [vmem:[#allocation10] sm:$0xff]  ;;  %v391_v49 = vld [vmem:[#allocation10 + $0x8] sm:$0xff]  ;;  %v392_v50 = vld [vmem:[#allocation10 + $0x10] sm:$0xff] }
  0x65   :  { %585 = vmatpush3.bf16.msra.mxu1 %v750_v8  ;;  %673 = vmatpush3.bf16.msra.mxu0 %v670_v17  ;;  %v702_v51 = vpack.c.bf16 %v391_v49, %v390_v48  ;;  %v393_v52 = vld [vmem:[#allocation10 + $0x18] sm:$0xff]  ;;  %v394_v54 = vld [vmem:[#allocation10 + $0x20] sm:$0xff]  ;;  %v395_v55 = vld [vmem:[#allocation10 + $0x28] sm:$0xff] }
  0x66   :  { %586 = vmatprep.subr.bf16.mxu1 %v905_v0  ;;  %675 = vmatprep.subr.bf16.mxu0 %v674_v19  ;;  %v706_v53 = vpack.c.bf16 %v393_v52, %v392_v50  ;;  %v710_v56 = vpack.c.bf16 %v395_v55, %v394_v54  ;;  %v396_v57 = vld [vmem:[#allocation10 + $0x30] sm:$0xff]  ;;  %v397_v58 = vld [vmem:[#allocation10 + $0x38] sm:$0xff]  ;;  %v398_v60 = vld [vmem:[#allocation10 + $0x40] sm:$0xff] }
  0x67   :  { %v714_v59 = vpack.c.bf16 %v397_v58, %v396_v57  ;;  %v399_v61 = vld [vmem:[#allocation10 + $0x48] sm:$0xff]  ;;  %v400_v63 = vld [vmem:[#allocation10 + $0x50] sm:$0xff]  ;;  %v402_v2 = vld [vmem:[#allocation10 + $0x60] sm:$0xff] }
  0x68   :  { %v718_v62 = vpack.c.bf16 %v399_v61, %v398_v60  ;;  %v403_v3 = vld [vmem:[#allocation10 + $0x68] sm:$0xff]  ;;  %v513_v5 = vld [vmem:[%s1064_s4] ss:$0 sm:$0xff]  ;;  %v404_v14 = vld [vmem:[#allocation10 + $0x70] sm:$0xff] }
  0x69   :  { %587 = vmatpush3.bf16.msra.mxu1 %v751_v9  ;;  %677 = vmatpush3.bf16.msra.mxu0 %v674_v19  ;;  %v726_v4 = vpack.c.bf16 %v403_v3, %v402_v2  ;;  %v405_v15 = vld [vmem:[#allocation10 + $0x78] sm:$0xff]  ;;  %v522_v17 = vld [vmem:[%s1066_s6] ss:$0 sm:$0xff]  ;;  %s866_s6 = scalar_lea.vmem %s496_s16, 256 }
  0x6a   :  { %588 = vmatprep.subr.bf16.mxu1 %v905_v0  ;;  %679 = vmatprep.subr.bf16.mxu0 %v678_v22  ;;  %v730_v16 = vpack.c.bf16 %v405_v15, %v404_v14  ;;  %v523_v24 = vld [vmem:[%s1068_s8] ss:$0 sm:$0xff]  ;;  %p867_p12 = scmp.ne.s32.totalorder %s496_s16, %s866_s6  ;;  %p872_p0 = scmp.lt.s32.totalorder %s866_s6, %s866_s6 }
  0x6c   :  { %p873_p1 = por %p872_p0, %p871_p13 }
  0x6d   :  { %589 = vmatpush3.bf16.msra.mxu1 %v752_v10  ;;  %681 = vmatpush3.bf16.msra.mxu0 %v678_v22 }
  0x6e   :  { %590 = vmatprep.subr.bf16.mxu1 %v905_v0  ;;  %683 = vmatprep.subr.bf16.mxu0 %v682_v25  ;;  %p874_p2 = pnand %p873_p1, %p867_p12 }
  0x71   :  { %591 = vmatpush3.bf16.msra.mxu1 %v753_v11  ;;  %685 = vmatpush3.bf16.msra.mxu0 %v682_v25 }
  0x72   :  { %592 = vmatprep.subr.bf16.mxu1 %v905_v0  ;;  %687 = vmatprep.subr.bf16.mxu0 %v686_v28 }
  0x75   :  { %593 = vmatpush3.bf16.msra.mxu1 %v754_v12  ;;  %689 = vmatpush3.bf16.msra.mxu0 %v686_v28 }
  0x76   :  { %594 = vmatprep.subr.bf16.mxu1 %v905_v0  ;;  %691 = vmatprep.subr.bf16.mxu0 %v690_v31  ;;  %v401_v0 = vld [vmem:[#allocation10 + $0x58] sm:$0xff] }
  0x77   :  { %v722_v1 = vpack.c.bf16 %v401_v0, %v400_v63 }
  0x79   :  { %595 = vmatpush3.bf16.msra.mxu1 %v755_v13  ;;  %693 = vmatpush3.bf16.msra.mxu0 %v690_v31 }
  0x7a   :  { %695 = vmatprep.subr.bf16.mxu0 %v694_v34  ;;  %703 = vmatprep.subr.bf16.mxu1 %v702_v51 }
  0x7d   :  { %697 = vmatpush3.bf16.msra.mxu0 %v694_v34 }
  0x7e   :  { %699 = vmatprep.subr.bf16.mxu0 %v698_v47 }
  0x81   :  { %701 = vmatpush3.bf16.msra.mxu0 %v698_v47 }
 0x137   :  { %v166_v36 = vpop.f32.mrb[0].mxu0 }
 0x138   :  { %v167_v37 = vadd.f32 %v509_v35, %v166_v36  ;;  %v578_v38 = vpop.f32.mrb[1].mxu0 }
 0x139   :  { %v169_v39 = vpop.f32.mrb[2].mxu0 }
 0x13a   :  { %v170_v40 = vadd.f32 %v509_v35, %v169_v39  ;;  %v579_v41 = vpop.f32.mrb[3].mxu0  ;;  %v173_v42 = vmax.f32 %v167_v37, 0.0 }
 0x13c   :  { %v174_v43 = vmax.f32 %v170_v40, 0.0 }
 0x13e   :  { %v175_v44 = vpack.c.bf16 %v174_v43, %v173_v42 }
 0x140   :  { %597 = vmatmul.mubr.bf16.vlgmr.msra.gmra.mrb[0].mxu1 %v175_v44 }
 0x141   :  { %705 = vmatpush3.bf16.msra.mxu1 %v702_v51 }
 0x142   :  { %707 = vmatprep.subr.bf16.mxu1 %v706_v53 }
 0x145   :  { %709 = vmatpush3.bf16.msra.mxu1 %v706_v53 }
 0x146   :  { %711 = vmatprep.subr.bf16.mxu1 %v710_v56 }
 0x149   :  { %713 = vmatpush3.bf16.msra.mxu1 %v710_v56 }
 0x14a   :  { %715 = vmatprep.subr.bf16.mxu1 %v714_v59 }
 0x14d   :  { %717 = vmatpush3.bf16.msra.mxu1 %v714_v59 }
 0x14e   :  { %719 = vmatprep.subr.bf16.mxu1 %v718_v62 }
 0x151   :  { %721 = vmatpush3.bf16.msra.mxu1 %v718_v62 }
 0x152   :  { %723 = vmatprep.subr.bf16.mxu1 %v722_v1 }
 0x155   :  { %725 = vmatpush3.bf16.msra.mxu1 %v722_v1 }
 0x156   :  { %727 = vmatprep.subr.bf16.mxu1 %v726_v4 }
 0x159   :  { %729 = vmatpush3.bf16.msra.mxu1 %v726_v4 }
 0x15a   :  { %731 = vmatprep.subr.bf16.mxu1 %v730_v16 }
 0x15d   :  { %733 = vmatpush3.bf16.msra.mxu1 %v730_v16 }
 0x213   :  { %v281_v6 = vpop.f32.mrb[0].mxu1 }
 0x214   :  { %v282_v7 = vadd.f32 %v513_v5, %v281_v6  ;;  %v598_v8 = vpop.f32.mrb[1].mxu1 }
 0x215   :  { %v284_v9 = vpop.f32.mrb[2].mxu1 }
 0x216   :  { %v288_v10 = vmax.f32 %v282_v7, 0.0  ;;  %v285_v11 = vadd.f32 %v513_v5, %v284_v9  ;;  %v599_v12 = vpop.f32.mrb[3].mxu1 }
 0x218   :  { %v289_v13 = vmax.f32 %v285_v11, 0.0  ;;  %632 = vmatprep.mubr.f32.mxu0 %v288_v10 }
 0x21a   :  { %633 = vmatmul.mubr.f32.vlgmr.msra.gmra.mrb[4].mxu0 %v289_v13 }
 0x2ed   :  { %v634_v18 = vpop.f32.mrb[4].mxu0 }
 0x2ee   :  { %v385_v19 = vadd.f32 %v634_v18, %v522_v17  ;;  %v379_v20 = vpop.f32.mrb[5].mxu0 }
 0x2ef   :  { %v380_v21 = vadd.f32 %v522_v17, %v379_v20 }
 0x2f0   :  { %v389_v23 = vmax.f32 %v385_v19, 0.0 }
 0x2f1   :  { %v388_v22 = vmax.f32 %v380_v21, 0.0 }
 0x2f3   :  { %667 = vmatprep.mubr.f32.mxu1 %v388_v22 }
 0x2f4   :  { %668 = vmatmul.mubr.f32.vlgmr.msra.gmra.mrb[4].mxu1 %v389_v23 }
 0x3c7   :  { %v669_v25 = vpop.f32.mrb[4].mxu1 }
 0x3c8   :  { %v485_v26 = vadd.f32 %v669_v25, %v523_v24  ;;  %v479_v27 = vpop.f32.mrb[5].mxu1 }
 0x3c9   :  { %v480_v28 = vadd.f32 %v523_v24, %v479_v27 }
 0x3ca   :  { %489 = vst [vmem:[#allocation11 + $0x8] sm:$0xff] %v485_v26 }
 0x3cb   :  { %488 = vst [vmem:[#allocation11] sm:$0xff] %v480_v28 }
 0x3cc   :  { %877 = shalt.err (!%p874_p2)
}
 0x3cd   :  { %s878_s8 = scalar_lea.hbm %s1069_s9, 256 }
 0x3ce   :  { %p879_p3 = scmp.ne.s32.totalorder %s1069_s9, %s878_s8  ;;  %p882_p4 = scmp.lt.u32.totalorder %s878_s8, %s1069_s9 }
 0x3d0   :  { %p884_p5 = pnand %p882_p4, %p879_p3 }
 0x3d2   :  { %887 = shalt.err (!%p884_p5)
}
 0x3d3   :  { %501 = dma.vmem_to_hbm [thread:$0]  %s496_s16, 256, %s1069_s9, [#allocation4], %s901_s10, %s901_s10, %s902_s14  }
 0x3d4   :  { %894 = dma.done.wait [#allocation4], 256  }
 0x3d5   :  { %895 = vsyncadd [#allocation4], 4294967040 }
 0x3d6   :  { %505 = vsyncpa [#allocation3], 1 }
 0x3d7   :  { %506 = vsyncpa [#allocation6], 1 }
 0x3d8   :  { %507 = vsyncpa [#allocation9], 1 }
 0x3d9   :  { %508 = vsyncpa [#allocation4], 1 }

</bundles_post_ra>
